<compile_context>
chip_gen: v6e
topology: v6e:2x2x1
jax: 0.10.0
libtpu: 0.0.40
codegen_flags: <defaults>
</compile_context>

<pallas_src>
import functools

import jax
import jax.numpy as jnp
from jax.experimental import pallas as pl
from jax.experimental.pallas import tpu as pltpu


def _round_up(x, m):
    return (x + m - 1) // m * m


def skip_mlp_kernel(x_ref, w1_ref, b1_ref, w2_ref, b2_ref, o_ref):
    # x_ref:  (tm, n_in_p)        block of input rows (native dtype)
    # w1_ref: (n_in_p, n_hid_p)   full weight, resident across grid steps
    # b1_ref: (1, n_hid_p)
    # w2_ref: (n_hid_p, n_in_p)   full weight, resident across grid steps
    # b2_ref: (1, n_in_p)
    x0 = x_ref[...]  # keep native dtype (bf16 feeds MXU at full rate)

    # linear1 + bias + ReLU  (MXU matmul, f32 accumulate)
    h = jnp.dot(x0, w1_ref[...], preferred_element_type=jnp.float32)
    h = h + b1_ref[...].astype(jnp.float32)
    h = jnp.maximum(h, 0.0)

    # dropout (inference -> identity), then linear2 + bias
    y = jnp.dot(h.astype(w2_ref.dtype), w2_ref[...],
                preferred_element_type=jnp.float32)
    y = y + b2_ref[...].astype(jnp.float32)

    # residual skip in f32, store in output dtype (lane-dense, unmasked vst)
    o_ref[...] = (y + x0.astype(jnp.float32)).astype(o_ref.dtype)


def _pad2d(a, rows, cols):
    """Zero-pad a 2-D array up to (rows, cols); no-op if already that shape."""
    pr, pc = rows - a.shape[0], cols - a.shape[1]
    if pr == 0 and pc == 0:
        return a
    return jnp.pad(a, ((0, pr), (0, pc)))


@functools.partial(jax.jit, static_argnames=("tm",))
def skip_mlp(x, w1, b1, w2, b2, *, tm=256):
    """x: [B, n_in]; w1: [n_in, n_hidden]; b1: [n_hidden];
    w2: [n_hidden, n_in]; b2: [n_in].  Returns [B, n_in]."""
    B, n_in = x.shape
    n_hidden = w1.shape[1]

    # ---- lane-dense padding of feature dims (multiples of 128) ----
    n_in_p = _round_up(n_in, 128)
    n_hid_p = _round_up(n_hidden, 128)

    # ---- row tile: multiple of the sublane pack, capped by the (padded) batch ----
    itemsize = jnp.dtype(x.dtype).itemsize
    pack = max(8, 32 // max(1, itemsize))  # 8 for f32, 16 for bf16, 32 for int8
    tm = max(pack, min(tm, _round_up(B, pack)))
    tm = _round_up(tm, pack)
    B_p = _round_up(B, tm)

    # ---- zero-pad operands (exact: padded K columns contribute 0) ----
    x_p = _pad2d(x, B_p, n_in_p)
    w1_p = _pad2d(w1, n_in_p, n_hid_p)
    b1_p = _pad2d(b1.reshape(1, -1), 1, n_hid_p)
    w2_p = _pad2d(w2, n_hid_p, n_in_p)
    b2_p = _pad2d(b2.reshape(1, -1), 1, n_in_p)

    grid = (B_p // tm,)

    # ---- VMEM budget: double-buffered x/out tiles + resident weights + f32 temps ----
    tile_bytes = tm * n_in_p * itemsize
    w_bytes = (n_in_p * n_hid_p + n_hid_p * n_in_p + n_hid_p + n_in_p) * itemsize
    f32_scratch = tm * n_hid_p * 4 + tm * n_in_p * 4
    need = 2 * (2 * tile_bytes) + 2 * w_bytes + f32_scratch
    vmem_limit = int(min(64 * 2**20, max(32 * 2**20, int(need * 1.5))))

    # ---- cost estimate hint for XLA scheduling around the custom call ----
    flops = 2 * B_p * n_in_p * n_hid_p * 2  # two matmuls
    bytes_accessed = (x_p.size + w1_p.size + w2_p.size
                      + b1_p.size + b2_p.size + B_p * n_in_p) * itemsize
    cost = pl.CostEstimate(flops=flops, transcendentals=0,
                           bytes_accessed=bytes_accessed)

    out_p = pl.pallas_call(
        skip_mlp_kernel,
        out_shape=jax.ShapeDtypeStruct((B_p, n_in_p), x.dtype),
        grid_spec=pltpu.PrefetchScalarGridSpec(
            num_scalar_prefetch=0,
            grid=grid,
            in_specs=[
                pl.BlockSpec((tm, n_in_p), lambda i: (i, 0)),        # x tile
                pl.BlockSpec((n_in_p, n_hid_p), lambda i: (0, 0)),   # W1 (resident)
                pl.BlockSpec((1, n_hid_p), lambda i: (0, 0)),        # b1
                pl.BlockSpec((n_hid_p, n_in_p), lambda i: (0, 0)),   # W2 (resident)
                pl.BlockSpec((1, n_in_p), lambda i: (0, 0)),         # b2
            ],
            out_specs=pl.BlockSpec((tm, n_in_p), lambda i: (i, 0)),  # lane-dense out
        ),
        compiler_params=pltpu.CompilerParams(
            dimension_semantics=("parallel",),
            vmem_limit_bytes=vmem_limit,
        ),
        cost_estimate=cost,
    )(x_p, w1_p, b1_p, w2_p, b2_p)

    # strip the padding
    return out_p[:B, :n_in]


def init_params(key, n_in, n_hidden, dtype=jnp.float32):
    """Deterministic init mimicking nn.Linear's U(-1/sqrt(fan_in), 1/sqrt(fan_in))."""
    k1, k2, k3, k4 = jax.random.split(key, 4)
    lim1 = 1.0 / jnp.sqrt(jnp.float32(n_in))
    lim2 = 1.0 / jnp.sqrt(jnp.float32(n_hidden))
    # stored transposed vs PyTorch: W1 [n_in, n_hidden], W2 [n_hidden, n_in]
    w1 = jax.random.uniform(k1, (n_in, n_hidden), dtype, -lim1, lim1)
    b1 = jax.random.uniform(k2, (n_hidden,), dtype, -lim1, lim1)
    w2 = jax.random.uniform(k3, (n_hidden, n_in), dtype, -lim2, lim2)
    b2 = jax.random.uniform(k4, (n_in,), dtype, -lim2, lim2)
    return w1, b1, w2, b2


if __name__ == "__main__":
    n_in, n_hidden, batch = 32, 64, 16

    key = jax.random.PRNGKey(0)
    kx, kp = jax.random.split(key)
    x = jax.random.normal(kx, (batch, n_in), jnp.float32)
    w1, b1, w2, b2 = init_params(kp, n_in, n_hidden)

    out = skip_mlp(x, w1, b1, w2, b2)
    out = jax.block_until_ready(out)

    # pure-JAX reference check (dropout is identity in eval mode)
    ref = jnp.maximum(x @ w1 + b1, 0.0) @ w2 + b2 + x
    assert out.shape == (batch, n_in)
    assert jnp.allclose(out, ref, atol=1e-5, rtol=1e-5), \
        float(jnp.max(jnp.abs(out - ref)))

    print("KERNEL_OK")
</pallas_src>

<mosaic_0001>
module attributes {stable_mosaic.version = 11 : i64} {
  func.func @skip_mlp_kernel(%arg0: i32, %arg1: memref<16x128xf32, #tpu.memory_space<vmem>>, %arg2: memref<128x128xf32, #tpu.memory_space<vmem>>, %arg3: memref<1x128xf32, #tpu.memory_space<vmem>>, %arg4: memref<128x128xf32, #tpu.memory_space<vmem>>, %arg5: memref<1x128xf32, #tpu.memory_space<vmem>>, %arg6: memref<16x128xf32, #tpu.memory_space<vmem>>) attributes {dimension_semantics = [#tpu.dimension_semantics<parallel>], iteration_bounds = array<i64: 1>, scalar_prefetch = 0 : i64, scratch_operands = 0 : i64, tpu.core_type = #tpu.core_type<tc>, window_params = [{transform_indices = @transform_0, window_bounds = array<i64: 16, 128>}, {pipeline_mode = #tpu.pipeline_mode<synchronous>, transform_indices = @transform_1, window_bounds = array<i64: 128, 128>}, {pipeline_mode = #tpu.pipeline_mode<synchronous>, transform_indices = @transform_2, window_bounds = array<i64: 1, 128>}, {pipeline_mode = #tpu.pipeline_mode<synchronous>, transform_indices = @transform_3, window_bounds = array<i64: 128, 128>}, {pipeline_mode = #tpu.pipeline_mode<synchronous>, transform_indices = @transform_4, window_bounds = array<i64: 1, 128>}, {transform_indices = @transform_5, window_bounds = array<i64: 16, 128>}]} {
    %c0 = arith.constant 0 : index
    %c0_0 = arith.constant 0 : index
    %0 = vector.load %arg1[%c0, %c0_0] : memref<16x128xf32, #tpu.memory_space<vmem>>, vector<16x128xf32>
    %c0_1 = arith.constant 0 : index
    %c0_2 = arith.constant 0 : index
    %1 = vector.load %arg2[%c0_1, %c0_2] : memref<128x128xf32, #tpu.memory_space<vmem>>, vector<128x128xf32>
    %cst = arith.constant dense<0.000000e+00> : vector<16x128xf32>
    %2 = tpu.matmul %0, %1, %cst {dimension_numbers = #tpu.dot_dimension_numbers<[1], [0], [0], [1], [0, 0, 1, 1], [], []>} : vector<16x128xf32>, vector<128x128xf32>, vector<16x128xf32> -> vector<16x128xf32>
    %c0_3 = arith.constant 0 : index
    %c0_4 = arith.constant 0 : index
    %3 = vector.load %arg3[%c0_3, %c0_4] : memref<1x128xf32, #tpu.memory_space<vmem>>, vector<1x128xf32>
    %4 = vector.broadcast %3 : vector<1x128xf32> to vector<16x128xf32>
    %5 = arith.addf %2, %4 : vector<16x128xf32>
    %cst_5 = arith.constant 0.000000e+00 : f32
    %6 = vector.broadcast %cst_5 : f32 to vector<16x128xf32>
    %7 = arith.maximumf %5, %6 : vector<16x128xf32>
    %c0_6 = arith.constant 0 : index
    %c0_7 = arith.constant 0 : index
    %8 = vector.load %arg4[%c0_6, %c0_7] : memref<128x128xf32, #tpu.memory_space<vmem>>, vector<128x128xf32>
    %cst_8 = arith.constant dense<0.000000e+00> : vector<16x128xf32>
    %9 = tpu.matmul %7, %8, %cst_8 {dimension_numbers = #tpu.dot_dimension_numbers<[1], [0], [0], [1], [0, 0, 1, 1], [], []>} : vector<16x128xf32>, vector<128x128xf32>, vector<16x128xf32> -> vector<16x128xf32>
    %c0_9 = arith.constant 0 : index
    %c0_10 = arith.constant 0 : index
    %10 = vector.load %arg5[%c0_9, %c0_10] : memref<1x128xf32, #tpu.memory_space<vmem>>, vector<1x128xf32>
    %11 = vector.broadcast %10 : vector<1x128xf32> to vector<16x128xf32>
    %12 = arith.addf %9, %11 : vector<16x128xf32>
    %13 = arith.addf %12, %0 : vector<16x128xf32>
    %c0_11 = arith.constant 0 : index
    %c0_12 = arith.constant 0 : index
    %14 = vector.load %arg6[%c0_11, %c0_12] : memref<16x128xf32, #tpu.memory_space<vmem>>, vector<16x128xf32>
    tpu.vector_store %arg6[%c0_11, %c0_12], %13 {strides = array<i32>} : memref<16x128xf32, #tpu.memory_space<vmem>>, vector<16x128xf32>,
    return
  }
  func.func @transform_0(%arg0: i32) -> (i32, i32) {
    %c0_i32 = arith.constant 0 : i32
    %c0_i32_0 = arith.constant 0 : i32
    return %arg0, %c0_i32 : i32, i32
  }
  func.func @transform_1(%arg0: i32) -> (i32, i32) {
    %c0_i32 = arith.constant 0 : i32
    %c0_i32_0 = arith.constant 0 : i32
    %c0_i32_1 = arith.constant 0 : i32
    return %c0_i32, %c0_i32_0 : i32, i32
  }
  func.func @transform_2(%arg0: i32) -> (i32, i32) {
    %c0_i32 = arith.constant 0 : i32
    %c0_i32_0 = arith.constant 0 : i32
    %c0_i32_1 = arith.constant 0 : i32
    return %c0_i32, %c0_i32_0 : i32, i32
  }
  func.func @transform_3(%arg0: i32) -> (i32, i32) {
    %c0_i32 = arith.constant 0 : i32
    %c0_i32_0 = arith.constant 0 : i32
    %c0_i32_1 = arith.constant 0 : i32
    return %c0_i32, %c0_i32_0 : i32, i32
  }
  func.func @transform_4(%arg0: i32) -> (i32, i32) {
    %c0_i32 = arith.constant 0 : i32
    %c0_i32_0 = arith.constant 0 : i32
    %c0_i32_1 = arith.constant 0 : i32
    return %c0_i32, %c0_i32_0 : i32, i32
  }
  func.func @transform_5(%arg0: i32) -> (i32, i32) {
    %c0_i32 = arith.constant 0 : i32
    %c0_i32_0 = arith.constant 0 : i32
    return %arg0, %c0_i32 : i32, i32
  }
}

</mosaic_0001>

<bundles_post_ra>
// kernel: skip_mlp.1
= control target key start
LH: loop header
LB: loop body
LE: loop exit
PB: predicated region body
PF: predicated region fallthrough
CT: control target
= control target key end

     0   :  { %s522_s0 = inlined_call_operand.vmem [shape: f32[16,128], index: 0, kind: input, shape index: {}]   ;;  %s523_s1 = inlined_call_operand.vmem [shape: f32[128,128], index: 1, kind: input, shape index: {}]   ;;  %s524_s2 = inlined_call_operand.vmem [shape: f32[1,128], index: 2, kind: input, shape index: {}]   ;;  %s525_s3 = inlined_call_operand.vmem [shape: f32[128,128], index: 3, kind: input, shape index: {}]   ;;  %s526_s4 = inlined_call_operand.vmem [shape: f32[1,128], index: 4, kind: input, shape index: {}]   ;;  %s527_s5 = inlined_call_operand.hbm [shape: f32[16,128], index: 5, kind: output, shape index: {}]  }
   0x1   :  { %v38_v0 = vld [vmem:[%s523_s1 + $0x78] sm:$0xff]  ;;  %v37_v1 = vld [vmem:[%s523_s1 + $0x70] sm:$0xff]  ;;  %v36_v2 = vld [vmem:[%s523_s1 + $0x68] sm:$0xff] }
   0x2   :  { %279 = vmatprep.subr.mxu0 %v38_v0  ;;  %v35_v3 = vld [vmem:[%s523_s1 + $0x60] sm:$0xff]  ;;  %v34_v5 = vld [vmem:[%s523_s1 + $0x58] sm:$0xff]  ;;  %v137_v7 = vld [vmem:[%s525_s3 + $0x70] sm:$0xff] }
   0x3   :  { %280 = vmatpush3.msra.mxu0 %v38_v0  ;;  %v422_v4 = vld [vmem:[%s522_s0] sm:$0xff]  ;;  %v138_v6 = vld [vmem:[%s525_s3 + $0x78] sm:$0xff]  ;;  %v33_v8 = vld [vmem:[%s523_s1 + $0x50] sm:$0xff] }
   0x4   :  { %281 = vmatprep.subr.mxu0 %v37_v1  ;;  %311 = vmatprep.mubr.f32.mxu0 %v422_v4  ;;  %v136_v9 = vld [vmem:[%s525_s3 + $0x68] sm:$0xff]  ;;  %v135_v11 = vld [vmem:[%s525_s3 + $0x60] sm:$0xff] }
   0x5   :  { %282 = vmatpush3.msra.mxu0 %v37_v1  ;;  %314 = vmatprep.subr.mxu1 %v138_v6  ;;  %v32_v10 = vld [vmem:[%s523_s1 + $0x48] sm:$0xff] }
   0x6   :  { %283 = vmatprep.subr.mxu0 %v36_v2  ;;  %315 = vmatpush3.msra.mxu1 %v138_v6 }
   0x7   :  { %284 = vmatpush3.msra.mxu0 %v36_v2  ;;  %316 = vmatprep.subr.mxu1 %v137_v7 }
   0x8   :  { %285 = vmatprep.subr.mxu0 %v35_v3  ;;  %317 = vmatpush3.msra.mxu1 %v137_v7 }
   0x9   :  { %286 = vmatpush3.msra.mxu0 %v35_v3 }
   0xa   :  { %287 = vmatprep.subr.mxu0 %v34_v5 }
   0xb   :  { %288 = vmatpush3.msra.mxu0 %v34_v5 }
   0xc   :  { %10 = vsyncpa [#allocation3], 0  ;;  %289 = vmatprep.subr.mxu0 %v33_v8  ;;  %318 = vmatprep.subr.mxu1 %v136_v9  ;;  %v31_v12 = vld [vmem:[%s523_s1 + $0x40] sm:$0xff]  ;;  %v134_v13 = vld [vmem:[%s525_s3 + $0x58] sm:$0xff] }
   0xd   :  { %290 = vmatpush3.msra.mxu0 %v33_v8  ;;  %319 = vmatpush3.msra.mxu1 %v136_v9  ;;  %v30_v14 = vld [vmem:[%s523_s1 + $0x38] sm:$0xff]  ;;  %v133_v15 = vld [vmem:[%s525_s3 + $0x50] sm:$0xff]  ;;  %v132_v17 = vld [vmem:[%s525_s3 + $0x48] sm:$0xff] }
   0xe   :  { %291 = vmatprep.subr.mxu0 %v32_v10  ;;  %320 = vmatprep.subr.mxu1 %v135_v11  ;;  %v29_v16 = vld [vmem:[%s523_s1 + $0x30] sm:$0xff]  ;;  %v28_v18 = vld [vmem:[%s523_s1 + $0x28] sm:$0xff]  ;;  %v131_v19 = vld [vmem:[%s525_s3 + $0x40] sm:$0xff] }
   0xf   :  { %292 = vmatpush3.msra.mxu0 %v32_v10  ;;  %321 = vmatpush3.msra.mxu1 %v135_v11  ;;  %v27_v20 = vld [vmem:[%s523_s1 + $0x20] sm:$0xff]  ;;  %v130_v21 = vld [vmem:[%s525_s3 + $0x38] sm:$0xff]  ;;  %v129_v23 = vld [vmem:[%s525_s3 + $0x30] sm:$0xff] }
  0x10   :  { %293 = vmatprep.subr.mxu0 %v31_v12  ;;  %322 = vmatprep.subr.mxu1 %v134_v13  ;;  %v26_v22 = vld [vmem:[%s523_s1 + $0x18] sm:$0xff]  ;;  %v25_v24 = vld [vmem:[%s523_s1 + $0x10] sm:$0xff]  ;;  %v128_v25 = vld [vmem:[%s525_s3 + $0x28] sm:$0xff] }
  0x11   :  { %294 = vmatpush3.msra.mxu0 %v31_v12  ;;  %323 = vmatpush3.msra.mxu1 %v134_v13  ;;  %v24_v26 = vld [vmem:[%s523_s1 + $0x8] sm:$0xff]  ;;  %v127_v27 = vld [vmem:[%s525_s3 + $0x20] sm:$0xff]  ;;  %v126_v30 = vld [vmem:[%s525_s3 + $0x18] sm:$0xff] }
  0x12   :  { %295 = vmatprep.subr.mxu0 %v30_v14  ;;  %324 = vmatprep.subr.mxu1 %v133_v15  ;;  %v23_v28 = vld [vmem:[%s523_s1] sm:$0xff]  ;;  %v22_v29 = vld [vmem:[%s522_s0 + $0x8] sm:$0xff]  ;;  %v125_v31 = vld [vmem:[%s525_s3 + $0x10] sm:$0xff] }
  0x13   :  { %296 = vmatpush3.msra.mxu0 %v30_v14  ;;  %325 = vmatpush3.msra.mxu1 %v133_v15  ;;  %v124_v32 = vld [vmem:[%s525_s3 + $0x8] sm:$0xff]  ;;  %v123_v33 = vld [vmem:[%s525_s3] sm:$0xff]  ;;  %s374_s3 = smov [#allocation2]  }
  0x14   :  { %297 = vmatprep.subr.mxu0 %v29_v16  ;;  %326 = vmatprep.subr.mxu1 %v132_v17  ;;  %v241_v34 = vld [vmem:[%s524_s2] ss:$0 sm:$0xff]  ;;  %s230_s13 = sshll.u32 %s374_s3, 4  ;;  %s231_s13 = int_to_ptr.vmem [resolvable:$true] %s230_s13 }
  0x15   :  { %298 = vmatpush3.msra.mxu0 %v29_v16  ;;  %327 = vmatpush3.msra.mxu1 %v132_v17  ;;  %v242_v41 = vld [vmem:[%s526_s4] ss:$0 sm:$0xff]  ;;  %s352_s2 = scalar_lea.vmem %s231_s13, 256  ;;  %p357_p1 = scmp.lt.s32.totalorder %s231_s13, %s231_s13 }
  0x16   :  { %299 = vmatprep.subr.mxu0 %v28_v18  ;;  %328 = vmatprep.subr.mxu1 %v131_v19  ;;  %p353_p0 = scmp.ne.s32.totalorder %s231_s13, %s352_s2  ;;  %p358_p2 = scmp.lt.s32.totalorder %s352_s2, %s352_s2 }
  0x17   :  { %300 = vmatpush3.msra.mxu0 %v28_v18  ;;  %329 = vmatpush3.msra.mxu1 %v131_v19 }
  0x18   :  { %301 = vmatprep.subr.mxu0 %v27_v20  ;;  %330 = vmatprep.subr.mxu1 %v130_v21  ;;  %p359_p3 = por %p358_p2, %p357_p1 }
  0x19   :  { %302 = vmatpush3.msra.mxu0 %v27_v20  ;;  %331 = vmatpush3.msra.mxu1 %v130_v21 }
  0x1a   :  { %303 = vmatprep.subr.mxu0 %v26_v22  ;;  %332 = vmatprep.subr.mxu1 %v129_v23  ;;  %p360_p4 = pnand %p359_p3, %p353_p0 }
  0x1b   :  { %304 = vmatpush3.msra.mxu0 %v26_v22  ;;  %333 = vmatpush3.msra.mxu1 %v129_v23 }
  0x1c   :  { %305 = vmatprep.subr.mxu0 %v25_v24  ;;  %334 = vmatprep.subr.mxu1 %v128_v25 }
  0x1d   :  { %306 = vmatpush3.msra.mxu0 %v25_v24  ;;  %335 = vmatpush3.msra.mxu1 %v128_v25 }
  0x1e   :  { %307 = vmatprep.subr.mxu0 %v24_v26  ;;  %336 = vmatprep.subr.mxu1 %v127_v27 }
  0x1f   :  { %308 = vmatpush3.msra.mxu0 %v24_v26  ;;  %337 = vmatpush3.msra.mxu1 %v127_v27 }
  0x20   :  { %309 = vmatprep.subr.mxu0 %v23_v28  ;;  %338 = vmatprep.subr.mxu1 %v126_v30 }
  0x21   :  { %310 = vmatpush3.msra.mxu0 %v23_v28  ;;  %339 = vmatpush3.msra.mxu1 %v126_v30 }
  0x22   :  { %312 = vmatmul.mubr.f32.vlgmr.msra.gmra.mxu0 %v22_v29  ;;  %340 = vmatprep.subr.mxu1 %v125_v31 }
  0x23   :  { %341 = vmatpush3.msra.mxu1 %v125_v31 }
  0x24   :  { %342 = vmatprep.subr.mxu1 %v124_v32 }
  0x25   :  { %343 = vmatpush3.msra.mxu1 %v124_v32 }
  0x26   :  { %344 = vmatprep.subr.mxu1 %v123_v33 }
  0x27   :  { %345 = vmatpush3.msra.mxu1 %v123_v33 }
  0xe2   :  { %v313_v35 = vpop.f32.mrf.mxu0 }
  0xe3   :  { %v118_v36 = vadd.f32 %v313_v35, %v241_v34 }
  0xe4   :  { %v112_v37 = vpop.f32.mrf.mxu0 }
  0xe5   :  { %v113_v38 = vadd.f32 %v241_v34, %v112_v37  ;;  %v122_v40 = vmax.f32 %v118_v36, 0.0 }
  0xe7   :  { %v121_v39 = vmax.f32 %v113_v38, 0.0 }
  0xe9   :  { %346 = vmatprep.mubr.f32.mxu1 %v121_v39 }
  0xea   :  { %347 = vmatmul.mubr.f32.vlgmr.msra.gmra.mxu1 %v122_v40 }
 0x1aa   :  { %v348_v42 = vpop.f32.mrf.mxu1 }
 0x1ab   :  { %v218_v43 = vadd.f32 %v348_v42, %v242_v41 }
 0x1ac   :  { %v212_v44 = vpop.f32.mrf.mxu1 }
 0x1ad   :  { %v222_v45 = vadd.f32 %v218_v43, %v22_v29  ;;  %v213_v46 = vadd.f32 %v242_v41, %v212_v44 }
 0x1af   :  { %224 = vst [vmem:[#allocation2 + $0x8] sm:$0xff] %v222_v45  ;;  %v221_v47 = vadd.f32 %v213_v46, %v422_v4 }
 0x1b1   :  { %223 = vst [vmem:[#allocation2] sm:$0xff] %v221_v47 }
 0x1b2   :  { %363 = shalt.err (!%p360_p4)
}
 0x1b3   :  { %s375_s4 = smov 128   ;;  %s376_s14 = smov 8  }
 0x1b4   :  { %236 = dma.vmem_to_hbm [thread:$0]  %s231_s13, 256, %s527_s5, [#allocation3], %s375_s4, %s375_s4, %s376_s14  }
 0x1b5   :  { %372 = dma.done.wait [#allocation3], 256  }
 0x1b6   :  { %373 = vsyncadd [#allocation3], 4294967040 }
 0x1b7   :  { %240 = vsyncpa [#allocation3], 1 }

</bundles_post_ra>
